<compile_context>
chip_gen: v6e
topology: v6e:2x2x1
jax: 0.10.0
libtpu: 0.0.40
codegen_flags: <defaults>
</compile_context>

<pallas_src>
import math
import functools

import jax
import jax.numpy as jnp
from jax.experimental import pallas as pl
from jax.experimental.pallas import tpu as pltpu


COMPUTE_DTYPE = jnp.bfloat16   # MXU operand dtype
SUBLANE_ALIGN = 16             # bf16 row tiles: second-minor dim multiple of 16
_NEG_BIG = -1e30


def _tpu_vmem_capacity():
    try:
        return int(pltpu.get_tpu_info().vmem_capacity_bytes)
    except Exception:
        return 64 * 1024 * 1024          # conservative (v7x-sized) fallback


_VMEM_CAP = _tpu_vmem_capacity()
VMEM_LIMIT = min(int(_VMEM_CAP * 0.7), 80 * 1024 * 1024)

# tile targets (re-derived at call time; small dims fall back to the full dim)
TM_TARGET = 256                                   # activation rows per block
TN_TARGET = 512                                   # output features per block
TK_TARGET = 1024                                  # contraction chunk (plain matmul)
TI_TARGET = 512 if _VMEM_CAP >= (100 << 20) else 256   # FFN chunk: smaller on 64MiB parts (v7x)
TKV_TARGET = 1024                                 # KV positions per attention step
TQ_ROWS_TARGET = 256                              # target rep*tq rows for the score tile


def _choose_tile(dim, target, align):
    """Largest align-multiple tile <= target that evenly divides dim; else full dim."""
    if dim <= target:
        return dim
    t = (target // align) * align
    while t >= align:
        if dim % t == 0:
            return t
        t -= align
    return dim


def find_multiple(n, k):
    return n if n % k == 0 else n + k - n % k


# ----------------------------------------------------------------------------
# Kernel 1: fused RMSNorm + Linear (norm -> QKV, and final norm -> logits).
#   grid = (M//tm, N//tn); the normalized activations are computed ONCE per
#   M-tile (at j==0) and cached in a VMEM scratch that carries across the
#   N axis (marked "arbitrary").
# ----------------------------------------------------------------------------
def _rms_matmul_kernel(x_ref, nw_ref, w_ref, o_ref, xn_sc, *, eps):
    @pl.when(pl.program_id(1) == 0)
    def _():
        x = x_ref[...].astype(jnp.float32)
        ms = jnp.mean(x * x, axis=-1, keepdims=True)
        xn = x * jax.lax.rsqrt(ms + eps) * nw_ref[...].astype(jnp.float32)
        xn_sc[...] = xn.astype(xn_sc.dtype)

    o_ref[...] = jax.lax.dot_general(
        xn_sc[...], w_ref[...], (((1,), (1,)), ((), ())),
        preferred_element_type=jnp.float32).astype(o_ref.dtype)


def rmsnorm_linear(x, norm_w, w, eps, out_dtype=None):
    """x: [M, K]; norm_w: [K]; w (torch layout): [N, K] -> [M, N]."""
    M, K = x.shape
    N = w.shape[0]
    out_dtype = x.dtype if out_dtype is None else out_dtype
    tm = _choose_tile(M, TM_TARGET, SUBLANE_ALIGN)
    tn = _choose_tile(N, TN_TARGET, 128)
    return pl.pallas_call(
        functools.partial(_rms_matmul_kernel, eps=eps),
        grid=(M // tm, N // tn),
        in_specs=[
            pl.BlockSpec((tm, K), lambda i, j: (i, 0)),
            pl.BlockSpec((1, K), lambda i, j: (0, 0)),
            pl.BlockSpec((tn, K), lambda i, j: (j, 0)),
        ],
        out_specs=pl.BlockSpec((tm, tn), lambda i, j: (i, j)),
        out_shape=jax.ShapeDtypeStruct((M, N), out_dtype),
        scratch_shapes=[pltpu.VMEM((tm, K), COMPUTE_DTYPE)],
        compiler_params=pltpu.CompilerParams(
            dimension_semantics=("parallel", "arbitrary"),
            vmem_limit_bytes=VMEM_LIMIT),
    )(x, norm_w.reshape(1, K).astype(jnp.float32), w)


# ----------------------------------------------------------------------------
# Kernel 2: tiled Linear with K-axis accumulation + fused residual add
#   (used for the wo projection: h = x + wo(y)).
# ----------------------------------------------------------------------------
def _matmul_res_kernel(x_ref, w_ref, res_ref, o_ref, acc_ref):
    @pl.when(pl.program_id(2) == 0)
    def _():
        acc_ref[...] = jnp.zeros_like(acc_ref)

    acc_ref[...] += jax.lax.dot_general(
        x_ref[...], w_ref[...], (((1,), (1,)), ((), ())),
        preferred_element_type=jnp.float32)

    @pl.when(pl.program_id(2) == pl.num_programs(2) - 1)
    def _():
        o_ref[...] = (acc_ref[...] + res_ref[...].astype(jnp.float32)
                      ).astype(o_ref.dtype)


def linear_residual(x, w, res):
    """x: [M, K]; w (torch layout): [N, K]; res: [M, N] -> res + x @ w.T."""
    M, K = x.shape
    N = w.shape[0]
    tm = _choose_tile(M, TM_TARGET, SUBLANE_ALIGN)
    tn = _choose_tile(N, TN_TARGET, 128)
    tk = _choose_tile(K, TK_TARGET, 128)
    return pl.pallas_call(
        _matmul_res_kernel,
        grid=(M // tm, N // tn, K // tk),
        in_specs=[
            pl.BlockSpec((tm, tk), lambda i, j, k: (i, k)),
            pl.BlockSpec((tn, tk), lambda i, j, k: (j, k)),
            pl.BlockSpec((tm, tn), lambda i, j, k: (i, j)),
        ],
        out_specs=pl.BlockSpec((tm, tn), lambda i, j, k: (i, j)),
        out_shape=jax.ShapeDtypeStruct((M, N), x.dtype),
        scratch_shapes=[pltpu.VMEM((tm, tn), jnp.float32)],
        compiler_params=pltpu.CompilerParams(
            dimension_semantics=("parallel", "parallel", "arbitrary"),
            vmem_limit_bytes=VMEM_LIMIT),
    )(x, w, res)


# ----------------------------------------------------------------------------
# Kernel 3: fused RMSNorm + SwiGLU FFN + residual, tiled over intermediate I.
#   w2 is stored pre-transposed as [I, D] so every weight block is a
#   row-contiguous slab (full-bandwidth DMA).  The FFN input x is itself the
#   residual, so the add is fused in the epilogue.
# ----------------------------------------------------------------------------
def _rms_ffn_kernel(x_ref, nw_ref, w1_ref, w3_ref, w2t_ref, o_ref,
                    xn_sc, acc_ref, *, eps):
    li = pl.program_id(1)

    @pl.when(li == 0)
    def _():
        x = x_ref[...].astype(jnp.float32)
        ms = jnp.mean(x * x, axis=-1, keepdims=True)
        xn = x * jax.lax.rsqrt(ms + eps) * nw_ref[...].astype(jnp.float32)
        xn_sc[...] = xn.astype(xn_sc.dtype)
        acc_ref[...] = jnp.zeros_like(acc_ref)

    xn = xn_sc[...]                                               # [tm, D] bf16
    h1 = jax.lax.dot_general(xn, w1_ref[...], (((1,), (1,)), ((), ())),
                             preferred_element_type=jnp.float32)
    h3 = jax.lax.dot_general(xn, w3_ref[...], (((1,), (1,)), ((), ())),
                             preferred_element_type=jnp.float32)
    h = (h1 * jax.nn.sigmoid(h1)) * h3                            # SwiGLU, f32
    acc_ref[...] += jax.lax.dot_general(
        h.astype(w2t_ref.dtype), w2t_ref[...], (((1,), (0,)), ((), ())),
        preferred_element_type=jnp.float32)

    @pl.when(li == pl.num_programs(1) - 1)
    def _():
        o_ref[...] = (acc_ref[...] + x_ref[...].astype(jnp.float32)
                      ).astype(o_ref.dtype)


def rmsnorm_ffn_residual(x, norm_w, w1, w3, w2t, eps):
    """x: [M, D]; w1, w3: [I, D]; w2t: [I, D] (pre-transposed) -> x + FFN(norm(x))."""
    M, D = x.shape
    I = w1.shape[0]
    tm = _choose_tile(M, TM_TARGET, SUBLANE_ALIGN)
    ti = _choose_tile(I, TI_TARGET, 128)
    return pl.pallas_call(
        functools.partial(_rms_ffn_kernel, eps=eps),
        grid=(M // tm, I // ti),
        in_specs=[
            pl.BlockSpec((tm, D), lambda i, l: (i, 0)),
            pl.BlockSpec((1, D), lambda i, l: (0, 0)),
            pl.BlockSpec((ti, D), lambda i, l: (l, 0)),
            pl.BlockSpec((ti, D), lambda i, l: (l, 0)),
            pl.BlockSpec((ti, D), lambda i, l: (l, 0)),
        ],
        out_specs=pl.BlockSpec((tm, D), lambda i, l: (i, 0)),
        out_shape=jax.ShapeDtypeStruct((M, D), x.dtype),
        scratch_shapes=[
            pltpu.VMEM((tm, D), COMPUTE_DTYPE),
            pltpu.VMEM((tm, D), jnp.float32),
        ],
        compiler_params=pltpu.CompilerParams(
            dimension_semantics=("parallel", "arbitrary"),
            vmem_limit_bytes=VMEM_LIMIT),
    )(x, norm_w.reshape(1, D).astype(jnp.float32), w1, w3, w2t)


# ----------------------------------------------------------------------------
# Kernel 4: GQA-folded flash attention with online softmax.
#   grid = (B, KVH, S//tq, T//tkv): one KV tile serves all rep query heads of a
#   group.  Causal horizon per Q tile is passed via scalar prefetch and used to
#   (a) skip the compute of fully-future KV tiles and (b) clamp the KV index
#   map so their DMA is not re-issued.  The 1/sqrt(Dh) scale is pre-folded
#   into Q.  Output is written lane-dense directly into [B, S, H*Dh].
# ----------------------------------------------------------------------------
def _flash_attn_kernel(qmax_ref, pos_ref, q_ref, k_ref, v_ref, o_ref,
                       m_sc, l_sc, acc_sc, *, tkv, rep, tq, head_dim):
    qi = pl.program_id(2)
    t = pl.program_id(3)

    @pl.when(t == 0)
    def _():
        m_sc[...] = jnp.full_like(m_sc, _NEG_BIG)
        l_sc[...] = jnp.zeros_like(l_sc)
        acc_sc[...] = jnp.zeros_like(acc_sc)

    # skip KV tiles entirely in the causal future of this Q tile
    @pl.when(t * tkv <= qmax_ref[qi])
    def _():
        if rep > 1:
            q = jnp.concatenate([q_ref[0, 0, r] for r in range(rep)], axis=0)
            q_pos = jnp.concatenate([pos_ref[...]] * rep, axis=0)
        else:
            q = q_ref[0, 0, 0]
            q_pos = pos_ref[...]
        k = k_ref[0, 0]                                            # [tkv, Dh]
        v = v_ref[0, 0]                                            # [tkv, Dh]

        s = jax.lax.dot_general(q, k, (((1,), (1,)), ((), ())),
                                preferred_element_type=jnp.float32)  # [rep*tq, tkv]
        kv_pos = jax.lax.broadcasted_iota(jnp.int32, s.shape, 1) + t * tkv
        allowed = kv_pos <= q_pos
        s = jnp.where(allowed, s, _NEG_BIG)

        m_prev = m_sc[...]
        m_new = jnp.maximum(m_prev, jnp.max(s, axis=-1, keepdims=True))
        alpha = jnp.exp(m_prev - m_new)
        p = jnp.where(allowed, jnp.exp(s - m_new), 0.0)

        l_sc[...] = alpha * l_sc[...] + jnp.sum(p, axis=-1, keepdims=True)
        acc_sc[...] = alpha * acc_sc[...] + jax.lax.dot_general(
            p.astype(v.dtype), v, (((1,), (0,)), ((), ())),
            preferred_element_type=jnp.float32)
        m_sc[...] = m_new

    @pl.when(t == pl.num_programs(3) - 1)
    def _():
        out = acc_sc[...] * pl.reciprocal(l_sc[...], approx=True)
        for r in range(rep):
            o_ref[0, :, r * head_dim:(r + 1) * head_dim] = (
                out[r * tq:(r + 1) * tq, :].astype(o_ref.dtype))


def flash_attention(q_grouped, k_cache, v_cache, input_pos):
    """q_grouped: [B, KVH, rep, S, Dh] (pre-scaled); caches: [B, KVH, T, Dh]."""
    B, KVH, rep, S, Dh = q_grouped.shape
    T = k_cache.shape[2]
    tq = _choose_tile(S, max(SUBLANE_ALIGN, TQ_ROWS_TARGET // rep), SUBLANE_ALIGN)
    tkv = _choose_tile(T, TKV_TARGET, 128)
    nq = S // tq

    pos2d = input_pos.reshape(S, 1).astype(jnp.int32)
    # per-Q-tile causal horizon, prefetched to SMEM
    qmax = jnp.max(pos2d.reshape(nq, tq), axis=-1).astype(jnp.int32)

    def kv_index(b, g, qi, t, qm):
        # clamp t past the causal horizon -> same block index -> no extra DMA
        return (b, g, jnp.minimum(t, qm[qi] // tkv), 0)

    return pl.pallas_call(
        functools.partial(_flash_attn_kernel, tkv=tkv, rep=rep, tq=tq, head_dim=Dh),
        grid_spec=pltpu.PrefetchScalarGridSpec(
            num_scalar_prefetch=1,
            grid=(B, KVH, nq, T // tkv),
            in_specs=[
                pl.BlockSpec((tq, 1), lambda b, g, qi, t, qm: (qi, 0)),
                pl.BlockSpec((1, 1, rep, tq, Dh),
                             lambda b, g, qi, t, qm: (b, g, 0, qi, 0)),
                pl.BlockSpec((1, 1, tkv, Dh), kv_index),
                pl.BlockSpec((1, 1, tkv, Dh), kv_index),
            ],
            out_specs=pl.BlockSpec((1, tq, rep * Dh),
                                   lambda b, g, qi, t, qm: (b, qi, g)),
            scratch_shapes=[
                pltpu.VMEM((rep * tq, 1), jnp.float32),
                pltpu.VMEM((rep * tq, 1), jnp.float32),
                pltpu.VMEM((rep * tq, Dh), jnp.float32),
            ]),
        out_shape=jax.ShapeDtypeStruct((B, S, KVH * rep * Dh), q_grouped.dtype),
        compiler_params=pltpu.CompilerParams(
            dimension_semantics=("parallel", "parallel", "parallel", "arbitrary"),
            vmem_limit_bytes=VMEM_LIMIT),
    )(qmax, pos2d, q_grouped, k_cache, v_cache)


# ----------------------------------------------------------------------------
# Plain-JAX glue (RoPE, KV-cache update, reshapes/splits)
# ----------------------------------------------------------------------------
def rope_cos_sin(input_pos, head_dim, base):
    inv_freq = 1.0 / (base ** (jnp.arange(0, head_dim, 2, dtype=jnp.float32) / head_dim))
    pos = input_pos.astype(jnp.float32)
    freqs = pos[:, None] * inv_freq[None, :]                      # [S, Dh/2]
    emb = jnp.concatenate([freqs, freqs], axis=-1)                # [S, Dh]
    return jnp.cos(emb), jnp.sin(emb)                             # attention_scaling == 1.0


def rotate_half(x):
    d = x.shape[-1] // 2
    return jnp.concatenate([-x[..., d:], x[..., :d]], axis=-1)


def transformer_block(p, x, input_pos, cos, sin, k_cache, v_cache, cfg):
    B, S, D = x.shape
    H, KVH, Dh = cfg["n_head"], cfg["n_local_heads"], cfg["head_dim"]
    rep = H // KVH
    eps = cfg["norm_eps"]
    kv_size = KVH * Dh
    x2d = x.reshape(B * S, D)

    # fused RMSNorm + QKV projection (norm computed once per M tile)
    qkv = rmsnorm_linear(x2d, p["in_ln_w"], p["wqkv"], eps)
    qkv = qkv.reshape(B, S, (H + 2 * KVH) * Dh)
    q, k, v = jnp.split(qkv, [H * Dh, H * Dh + kv_size], axis=-1)
    q = q.reshape(B, S, H, Dh).astype(jnp.float32)
    k = k.reshape(B, S, KVH, Dh).astype(jnp.float32)
    v = v.reshape(B, S, KVH, Dh)

    cos4 = cos[None, :, None, :]
    sin4 = sin[None, :, None, :]
    q = q * cos4 + rotate_half(q) * sin4
    k = k * cos4 + rotate_half(k) * sin4
    q = q * (1.0 / math.sqrt(Dh))             # fold softmax scale into Q once

    # regroup Q for GQA-folded attention: [B, KVH, rep, S, Dh]
    q_grouped = q.reshape(B, S, KVH, rep, Dh).transpose(0, 2, 3, 1, 4).astype(COMPUTE_DTYPE)
    k_t = k.transpose(0, 2, 1, 3).astype(COMPUTE_DTYPE)           # [B, KVH, S, Dh]
    v_t = v.transpose(0, 2, 1, 3).astype(COMPUTE_DTYPE)

    # TODO(synk): assumes contiguous input_pos (standard prefill/decode); the torch
    # reference allows an arbitrary-index scatter into the cache.
    pos0 = input_pos[0]
    k_cache = jax.lax.dynamic_update_slice(k_cache, k_t, (0, 0, pos0, 0))
    v_cache = jax.lax.dynamic_update_slice(v_cache, v_t, (0, 0, pos0, 0))

    y = flash_attention(q_grouped, k_cache, v_cache, input_pos)   # [B, S, D]

    # wo projection with the residual add fused into the epilogue
    h2d = linear_residual(y.reshape(B * S, D), p["wo"], x2d)

    # fused RMSNorm + SwiGLU FFN + residual
    out2d = rmsnorm_ffn_residual(h2d, p["post_ln_w"], p["w1"], p["w3"], p["w2t"], eps)
    return out2d.reshape(B, S, D), k_cache, v_cache


def transformer_forward(params, idx, input_pos, caches, cfg):
    B, S = idx.shape
    D = cfg["dim"]
    cos, sin = rope_cos_sin(input_pos, cfg["head_dim"], cfg["rope_base"])

    x = params["tok_emb"][idx]                                    # [B, S, D] bf16
    new_caches = []
    for li, layer_p in enumerate(params["layers"]):
        k_cache, v_cache = caches[li]
        x, k_cache, v_cache = transformer_block(
            layer_p, x, input_pos, cos, sin, k_cache, v_cache, cfg)
        new_caches.append((k_cache, v_cache))

    logits = rmsnorm_linear(x.reshape(B * S, D), params["norm_w"],
                            params["output_w"], cfg["norm_eps"],
                            out_dtype=jnp.float32)                # f32 head output
    return logits.reshape(B, S, -1), new_caches


# ----------------------------------------------------------------------------
# Deterministic parameter / cache init
# ----------------------------------------------------------------------------
def init_params(key, cfg):
    D = cfg["dim"]
    H, KVH, Dh = cfg["n_head"], cfg["n_local_heads"], cfg["head_dim"]
    I = cfg["intermediate_size"]
    V = cfg["vocab_size"]
    total_head_dim = (H + 2 * KVH) * Dh

    def norm(k, shape, scale=0.02):
        return (scale * jax.random.normal(k, shape, dtype=jnp.float32)
                ).astype(COMPUTE_DTYPE)

    keys = jax.random.split(key, 2 + 6 * cfg["n_layer"])
    params = {
        "tok_emb": norm(keys[0], (V, D)),
        "norm_w": jnp.ones((D,), jnp.float32),
        "output_w": norm(keys[1], (V, D)),
        "layers": [],
    }
    for li in range(cfg["n_layer"]):
        k = keys[2 + 6 * li: 2 + 6 * (li + 1)]
        params["layers"].append({
            "in_ln_w": jnp.ones((D,), jnp.float32),
            "post_ln_w": jnp.ones((D,), jnp.float32),
            "wqkv": norm(k[0], (total_head_dim, D)),
            "wo": norm(k[1], (D, D)),
            "w1": norm(k[2], (I, D)),
            "w3": norm(k[3], (I, D)),
            # w2 stored pre-transposed as [I, D] (torch weight would be [D, I])
            "w2t": norm(k[4], (I, D)),
        })
    return params


def init_caches(cfg, B):
    T = cfg["max_seq_length"]
    KVH, Dh = cfg["n_local_heads"], cfg["head_dim"]
    return [(jnp.zeros((B, KVH, T, Dh), COMPUTE_DTYPE),
             jnp.zeros((B, KVH, T, Dh), COMPUTE_DTYPE))
            for _ in range(cfg["n_layer"])]


# ----------------------------------------------------------------------------
# Main
# ----------------------------------------------------------------------------
if __name__ == "__main__":
    # Small Llama-style config (ModelArgs semantics: head_dim = dim // n_head).
    # head_dim = 128 like the real Llama configs, so attention tiles are lane-dense.
    cfg = dict(
        model_name="llama-test",
        block_size=32,
        vocab_size=512,
        n_layer=2,
        n_head=2,
        n_local_heads=1,
        dim=256,
        intermediate_size=512,
        rope_base=10000.0,
        norm_eps=1e-5,
    )
    cfg["head_dim"] = cfg["dim"] // cfg["n_head"]

    B, S = 2, 8
    cfg["max_seq_length"] = find_multiple(S, 8)   # setup_caches semantics

    key = jax.random.PRNGKey(0)
    pkey, ikey = jax.random.split(key)
    params = init_params(pkey, cfg)
    caches = init_caches(cfg, B)

    idx = jax.random.randint(ikey, (B, S), 0, cfg["vocab_size"], dtype=jnp.int32)
    input_pos = jnp.arange(S, dtype=jnp.int32)

    logits, caches = transformer_forward(params, idx, input_pos, caches, cfg)
    logits = jax.block_until_ready(logits)

    assert logits.shape == (B, S, cfg["vocab_size"])
    assert logits.dtype == jnp.float32
    assert bool(jnp.all(jnp.isfinite(logits)))
    print("KERNEL_OK")
</pallas_src>

<mosaic_0001>
module attributes {stable_mosaic.version = 11 : i64} {
  func.func @_rms_matmul_kernel(%arg0: i32, %arg1: i32, %arg2: memref<16x256xbf16, #tpu.memory_space<vmem>>, %arg3: memref<1x256xf32, #tpu.memory_space<vmem>>, %arg4: memref<512x256xbf16, #tpu.memory_space<vmem>>, %arg5: memref<16x512xbf16, #tpu.memory_space<vmem>>, %arg6: memref<16x256xbf16, #tpu.memory_space<vmem>>) attributes {dimension_semantics = [#tpu.dimension_semantics<parallel>, #tpu.dimension_semantics<arbitrary>], iteration_bounds = array<i64: 1, 1>, scalar_prefetch = 0 : i64, scratch_operands = 1 : i64, tpu.core_type = #tpu.core_type<tc>, window_params = [{transform_indices = @transform_0, window_bounds = array<i64: 16, 256>}, {pipeline_mode = #tpu.pipeline_mode<synchronous>, transform_indices = @transform_1, window_bounds = array<i64: 1, 256>}, {transform_indices = @transform_2, window_bounds = array<i64: 512, 256>}, {transform_indices = @transform_3, window_bounds = array<i64: 16, 512>}]} {
    %c0_i32 = arith.constant 0 : i32
    %0 = arith.cmpi eq, %arg1, %c0_i32 : i32
    %1 = arith.extui %0 : i1 to i32
    %c0_i32_0 = arith.constant 0 : i32
    %2 = arith.cmpi ne, %1, %c0_i32_0 : i32
    scf.if %2 {
      %c0_6 = arith.constant 0 : index
      %c0_7 = arith.constant 0 : index
      %8 = vector.load %arg2[%c0_6, %c0_7] : memref<16x256xbf16, #tpu.memory_space<vmem>>, vector<16x256xbf16>
      %9 = arith.extf %8 : vector<16x256xbf16> to vector<16x256xf32>
      %10 = arith.mulf %9, %9 : vector<16x256xf32>
      %cst_8 = arith.constant dense<0.000000e+00> : vector<16xf32>
      %11 = vector.multi_reduction <add>, %10, %cst_8 [1] : vector<16x256xf32> to vector<16xf32>
      %12 = vector.shape_cast %11 : vector<16xf32> to vector<16x1xf32>
      %cst_9 = arith.constant 2.560000e+02 : f32
      %13 = vector.broadcast %cst_9 : f32 to vector<16x1xf32>
      %14 = arith.divf %12, %13 : vector<16x1xf32>
      %cst_10 = arith.constant 9.99999974E-6 : f32
      %15 = vector.broadcast %cst_10 : f32 to vector<16x1xf32>
      %16 = arith.addf %14, %15 : vector<16x1xf32>
      %17 = math.rsqrt %16 : vector<16x1xf32>
      %18 = vector.broadcast %17 : vector<16x1xf32> to vector<16x256xf32>
      %19 = arith.mulf %9, %18 : vector<16x256xf32>
      %c0_11 = arith.constant 0 : index
      %c0_12 = arith.constant 0 : index
      %20 = vector.load %arg3[%c0_11, %c0_12] : memref<1x256xf32, #tpu.memory_space<vmem>>, vector<1x256xf32>
      %21 = vector.broadcast %20 : vector<1x256xf32> to vector<16x256xf32>
      %22 = arith.mulf %19, %21 : vector<16x256xf32>
      %23 = arith.truncf %22 : vector<16x256xf32> to vector<16x256xbf16>
      %c0_13 = arith.constant 0 : index
      %c0_14 = arith.constant 0 : index
      %24 = vector.load %arg6[%c0_13, %c0_14] : memref<16x256xbf16, #tpu.memory_space<vmem>>, vector<16x256xbf16>
      tpu.vector_store %arg6[%c0_13, %c0_14], %23 {strides = array<i32>} : memref<16x256xbf16, #tpu.memory_space<vmem>>, vector<16x256xbf16>,
    } else {
    }
    %c0 = arith.constant 0 : index
    %c0_1 = arith.constant 0 : index
    %3 = vector.load %arg6[%c0, %c0_1] : memref<16x256xbf16, #tpu.memory_space<vmem>>, vector<16x256xbf16>
    %c0_2 = arith.constant 0 : index
    %c0_3 = arith.constant 0 : index
    %4 = vector.load %arg4[%c0_2, %c0_3] : memref<512x256xbf16, #tpu.memory_space<vmem>>, vector<512x256xbf16>
    %cst = arith.constant dense<0.000000e+00> : vector<16x512xf32>
    %5 = tpu.matmul %3, %4, %cst {dimension_numbers = #tpu.dot_dimension_numbers<[1], [1], [0], [0], [0, 0, 1, 0], [], []>} : vector<16x256xbf16>, vector<512x256xbf16>, vector<16x512xf32> -> vector<16x512xf32>
    %6 = arith.truncf %5 : vector<16x512xf32> to vector<16x512xbf16>
    %c0_4 = arith.constant 0 : index
    %c0_5 = arith.constant 0 : index
    %7 = vector.load %arg5[%c0_4, %c0_5] : memref<16x512xbf16, #tpu.memory_space<vmem>>, vector<16x512xbf16>
    tpu.vector_store %arg5[%c0_4, %c0_5], %6 {strides = array<i32>} : memref<16x512xbf16, #tpu.memory_space<vmem>>, vector<16x512xbf16>,
    return
  }
  func.func @transform_0(%arg0: i32, %arg1: i32) -> (i32, i32) {
    %c0_i32 = arith.constant 0 : i32
    %c0_i32_0 = arith.constant 0 : i32
    return %arg0, %c0_i32 : i32, i32
  }
  func.func @transform_1(%arg0: i32, %arg1: i32) -> (i32, i32) {
    %c0_i32 = arith.constant 0 : i32
    %c0_i32_0 = arith.constant 0 : i32
    %c0_i32_1 = arith.constant 0 : i32
    return %c0_i32, %c0_i32_0 : i32, i32
  }
  func.func @transform_2(%arg0: i32, %arg1: i32) -> (i32, i32) {
    %c0_i32 = arith.constant 0 : i32
    %c0_i32_0 = arith.constant 0 : i32
    return %arg1, %c0_i32 : i32, i32
  }
  func.func @transform_3(%arg0: i32, %arg1: i32) -> (i32, i32) {
    %c0_i32 = arith.constant 0 : i32
    return %arg0, %arg1 : i32, i32
  }
}

</mosaic_0001>

<bundles_post_ra>
// kernel: tpu_custom_call.1
= control target key start
LH: loop header
LB: loop body
LE: loop exit
PB: predicated region body
PF: predicated region fallthrough
CT: control target
= control target key end

     0   :  { %8 = vsyncpa [#allocation4], 0  ;;  %s977_s0 = inlined_call_operand.hbm [shape: bf16[16,256], index: 0, kind: input, shape index: {}]   ;;  %s978_s1 = inlined_call_operand.hbm [shape: f32[1,256], index: 1, kind: input, shape index: {}]   ;;  %s979_s2 = inlined_call_operand.hbm [shape: bf16[512,256], index: 2, kind: input, shape index: {}]   ;;  %s980_s3 = inlined_call_operand.hbm [shape: bf16[16,512], index: 3, kind: output, shape index: {}]  }
   0x1   :  { %9 = vsyncpa [#allocation7], 0 }
   0x2   :  { %10 = vsyncpa [#allocation5], 0  ;;  %s917_s12 = smov [#allocation6]   ;;  %s918_s14 = smov [#allocation3]  }
   0x3   :  { %s29_s13 = sshll.u32 %s917_s12, 4  ;;  %s16_s15 = sshll.u32 %s918_s14, 4  ;;  %s30_s13 = int_to_ptr.vmem [resolvable:$true] %s29_s13  ;;  %s17_s15 = int_to_ptr.vmem [resolvable:$true] %s16_s15 }
   0x4   :  { %s839_s16 = scalar_lea.vmem %s30_s13, 32  ;;  %p844_p1 = scmp.lt.s32.totalorder %s30_s13, %s30_s13 }
   0x5   :  { %p840_p0 = scmp.ne.s32.totalorder %s30_s13, %s839_s16  ;;  %p845_p2 = scmp.lt.s32.totalorder %s839_s16, %s839_s16 }
   0x7   :  { %p846_p3 = por %p845_p2, %p844_p1 }
   0x9   :  { %p847_p4 = pnand %p846_p3, %p840_p0 }
   0xb   :  { %850 = shalt.err (!%p847_p4)
}
   0xc   :  { %32 = dma.hbm_to_vmem [thread:$0]  %s978_s1, 32, %s30_s13, [#allocation7]  }
   0xd   :  { %s859_s19 = scalar_lea.vmem %s17_s15, 256  ;;  %p864_p6 = scmp.lt.s32.totalorder %s17_s15, %s17_s15 }
   0xe   :  { %p860_p5 = scmp.ne.s32.totalorder %s17_s15, %s859_s19  ;;  %p865_p7 = scmp.lt.s32.totalorder %s859_s19, %s859_s19 }
  0x10   :  { %p866_p8 = por %p865_p7, %p864_p6 }
  0x12   :  { %p867_p9 = pnand %p866_p8, %p860_p5 }
  0x14   :  { %870 = shalt.err (!%p867_p9)
}
  0x15   :  { %s919_s20 = smov 128   ;;  %s920_s21 = smov 8  }
  0x16   :  { %22 = dma.hbm_to_vmem [thread:$0]  %s977_s0, 256, %s17_s15, [#allocation4], %s919_s20, %s919_s20, %s920_s21  }
  0x17   :  { %s921_s24 = smov [#allocation8]  }
  0x18   :  { %s38_s25 = sshll.u32 %s921_s24, 4  ;;  %s39_s25 = int_to_ptr.vmem [resolvable:$true] %s38_s25 }
  0x19   :  { %s879_s26 = scalar_lea.vmem %s39_s25, 8192  ;;  %p884_p11 = scmp.lt.s32.totalorder %s39_s25, %s39_s25 }
  0x1a   :  { %p880_p10 = scmp.ne.s32.totalorder %s39_s25, %s879_s26  ;;  %p885_p12 = scmp.lt.s32.totalorder %s879_s26, %s879_s26 }
  0x1c   :  { %p886_p13 = por %p885_p12, %p884_p11 }
  0x1e   :  { %p887_p0 = pnand %p886_p13, %p880_p10 }
  0x20   :  { %890 = shalt.err (!%p887_p0)
}
  0x21   :  { %44 = dma.hbm_to_vmem [thread:$0]  %s979_s2, 8192, %s39_s25, [#allocation7], %s919_s20, %s919_s20, %s920_s21  }
  0x22   :  { %911 = dma.done.wait [#allocation4], 256  }
  0x23   :  { %912 = vsyncadd [#allocation4], 4294967040 }
  0x24   :  { %913 = dma.done.wait [#allocation7], 8224  }
  0x25   :  { %914 = vsyncadd [#allocation7], 4294959072  ;;  %v58_v0 = vld [vmem:[#allocation3] sm:$0xff]  ;;  %v59_v1 = vld [vmem:[#allocation3 + $0x8] sm:$0xff]  ;;  %s922_s0 = smov [#allocation9]  }
  0x26   :  { %v954_v2 = vunpack.c.l.bf16 %v58_v0  ;;  %v956_v3 = vunpack.c.h.bf16 %v58_v0  ;;  %v958_v4 = vunpack.c.l.bf16 %v59_v1  ;;  %v960_v5 = vunpack.c.h.bf16 %v59_v1  ;;  %v731_v6 = vld [vmem:[#allocation8 + $0x74] ss:$8 sps:$4 sm:$0xff]   ;;  %v735_v8 = vld [vmem:[#allocation8 + $0x70] ss:$8 sps:$4 sm:$0xff]   ;;  %v737_v14 = vld [vmem:[#allocation8 + $0x64] ss:$8 sps:$4 sm:$0xff]  }
  0x27   :  { %v733_v7 = vld [vmem:[#allocation8 + $0x174] ss:$8 sps:$4 sm:$0xff]   ;;  %511 = vmatprep.subr.bf16.mxu0 %v731_v6  ;;  %v736_v13 = vld [vmem:[#allocation8 + $0x170] ss:$8 sps:$4 sm:$0xff]   ;;  %v739_v16 = vld [vmem:[#allocation8 + $0x164] ss:$8 sps:$4 sm:$0xff]  }
  0x28   :  { %v64_v9 = vmul.f32 %v954_v2, %v954_v2  ;;  %v65_v10 = vmul.f32 %v956_v3, %v956_v3  ;;  %v66_v11 = vmul.f32 %v958_v4, %v958_v4  ;;  %v67_v12 = vmul.f32 %v960_v5, %v960_v5  ;;  %554 = vmatprep.subr.bf16.mxu1 %v733_v7  ;;  %v741_v18 = vld [vmem:[#allocation8 + $0x60] ss:$8 sps:$4 sm:$0xff]   ;;  %v743_v20 = vld [vmem:[#allocation8 + $0x54] ss:$8 sps:$4 sm:$0xff]   ;;  %v747_v22 = vld [vmem:[#allocation8 + $0x50] ss:$8 sps:$4 sm:$0xff]  }
  0x29   :  { %512 = vmatpush1.bf16.xpose.msra.mxu0 %v735_v8  ;;  %555 = vmatpush1.bf16.xpose.msra.mxu1 %v736_v13  ;;  %v742_v19 = vld [vmem:[#allocation8 + $0x160] ss:$8 sps:$4 sm:$0xff]   ;;  %v745_v21 = vld [vmem:[#allocation8 + $0x154] ss:$8 sps:$4 sm:$0xff]   ;;  %v748_v23 = vld [vmem:[#allocation8 + $0x150] ss:$8 sps:$4 sm:$0xff]  }
  0x2a   :  { %v68_v15 = vadd.f32 %v65_v10, %v64_v9  ;;  %513 = vmatprep.subr.bf16.mxu0 %v737_v14  ;;  %v71_v17 = vadd.f32 %v67_v12, %v66_v11  ;;  %556 = vmatprep.subr.bf16.mxu1 %v739_v16  ;;  %v749_v24 = vld [vmem:[#allocation8 + $0x44] ss:$8 sps:$4 sm:$0xff]   ;;  %v753_v26 = vld [vmem:[#allocation8 + $0x40] ss:$8 sps:$4 sm:$0xff]   ;;  %v755_v28 = vld [vmem:[#allocation8 + $0x34] ss:$8 sps:$4 sm:$0xff]  }
  0x2b   :  { %v751_v25 = vld [vmem:[#allocation8 + $0x144] ss:$8 sps:$4 sm:$0xff]   ;;  %v754_v27 = vld [vmem:[#allocation8 + $0x140] ss:$8 sps:$4 sm:$0xff]   ;;  %v757_v29 = vld [vmem:[#allocation8 + $0x134] ss:$8 sps:$4 sm:$0xff]  }
  0x2c   :  { %69 = vadd.xlane.f32.xlu0 %v68_v15  ;;  %v759_v30 = vld [vmem:[#allocation8 + $0x30] ss:$8 sps:$4 sm:$0xff]   ;;  %v761_v32 = vld [vmem:[#allocation8 + $0x24] ss:$8 sps:$4 sm:$0xff]   ;;  %v765_v34 = vld [vmem:[#allocation8 + $0x20] ss:$8 sps:$4 sm:$0xff]  }
  0x2d   :  { %v760_v31 = vld [vmem:[#allocation8 + $0x130] ss:$8 sps:$4 sm:$0xff]   ;;  %v763_v33 = vld [vmem:[#allocation8 + $0x124] ss:$8 sps:$4 sm:$0xff]   ;;  %v766_v35 = vld [vmem:[#allocation8 + $0x120] ss:$8 sps:$4 sm:$0xff]  }
  0x2e   :  { %v767_v36 = vld [vmem:[#allocation8 + $0x14] ss:$8 sps:$4 sm:$0xff]   ;;  %v771_v38 = vld [vmem:[#allocation8 + $0x10] ss:$8 sps:$4 sm:$0xff]   ;;  %v773_v40 = vld [vmem:[#allocation8 + $0x4] ss:$8 sps:$4 sm:$0xff]  }
  0x2f   :  { %v769_v37 = vld [vmem:[#allocation8 + $0x114] ss:$8 sps:$4 sm:$0xff]   ;;  %v772_v39 = vld [vmem:[#allocation8 + $0x110] ss:$8 sps:$4 sm:$0xff]   ;;  %v775_v41 = vld [vmem:[#allocation8 + $0x104] ss:$8 sps:$4 sm:$0xff]  }
  0x30   :  { %72 = vadd.xlane.f32.xlu0 %v71_v17  ;;  %v777_v42 = vld [vmem:[#allocation8] ss:$8 sps:$4 sm:$0xff]   ;;  %v779_v44 = vld [vmem:[#allocation8 + $0xf4] ss:$8 sps:$4 sm:$0xff]   ;;  %v783_v46 = vld [vmem:[#allocation8 + $0xf0] ss:$8 sps:$4 sm:$0xff]  }
  0x31   :  { %514 = vmatpush1.bf16.xpose.msra.mxu0 %v741_v18  ;;  %557 = vmatpush1.bf16.xpose.msra.mxu1 %v742_v19  ;;  %v778_v43 = vld [vmem:[#allocation8 + $0x100] ss:$8 sps:$4 sm:$0xff]   ;;  %v781_v45 = vld [vmem:[#allocation8 + $0x1f4] ss:$8 sps:$4 sm:$0xff]   ;;  %v784_v47 = vld [vmem:[#allocation8 + $0x1f0] ss:$8 sps:$4 sm:$0xff]  }
  0x32   :  { %515 = vmatprep.subr.bf16.mxu0 %v743_v20  ;;  %558 = vmatprep.subr.bf16.mxu1 %v745_v21  ;;  %v785_v48 = vld [vmem:[#allocation8 + $0xe4] ss:$8 sps:$4 sm:$0xff]   ;;  %v789_v50 = vld [vmem:[#allocation8 + $0xe0] ss:$8 sps:$4 sm:$0xff]   ;;  %v791_v52 = vld [vmem:[#allocation8 + $0xd4] ss:$8 sps:$4 sm:$0xff]  }
  0x33   :  { %v787_v49 = vld [vmem:[#allocation8 + $0x1e4] ss:$8 sps:$4 sm:$0xff]   ;;  %v790_v51 = vld [vmem:[#allocation8 + $0x1e0] ss:$8 sps:$4 sm:$0xff]   ;;  %v793_v53 = vld [vmem:[#allocation8 + $0x1d4] ss:$8 sps:$4 sm:$0xff]  }
  0x34   :  { %v795_v54 = vld [vmem:[#allocation8 + $0xd0] ss:$8 sps:$4 sm:$0xff]   ;;  %v797_v56 = vld [vmem:[#allocation8 + $0xc4] ss:$8 sps:$4 sm:$0xff]   ;;  %v801_v58 = vld [vmem:[#allocation8 + $0xc0] ss:$8 sps:$4 sm:$0xff]  }
  0x35   :  { %v796_v55 = vld [vmem:[#allocation8 + $0x1d0] ss:$8 sps:$4 sm:$0xff]   ;;  %v799_v57 = vld [vmem:[#allocation8 + $0x1c4] ss:$8 sps:$4 sm:$0xff]   ;;  %v802_v59 = vld [vmem:[#allocation8 + $0x1c0] ss:$8 sps:$4 sm:$0xff]  }
  0x36   :  { %v803_v60 = vld [vmem:[#allocation8 + $0xb4] ss:$8 sps:$4 sm:$0xff]   ;;  %v807_v62 = vld [vmem:[#allocation8 + $0xb0] ss:$8 sps:$4 sm:$0xff]   ;;  %v809_v0 = vld [vmem:[#allocation8 + $0xa4] ss:$8 sps:$4 sm:$0xff]  }
  0x37   :  { %v805_v61 = vld [vmem:[#allocation8 + $0x1b4] ss:$8 sps:$4 sm:$0xff]   ;;  %v808_v63 = vld [vmem:[#allocation8 + $0x1b0] ss:$8 sps:$4 sm:$0xff]   ;;  %v811_v1 = vld [vmem:[#allocation8 + $0x1a4] ss:$8 sps:$4 sm:$0xff]  }
  0x38   :  { %v813_v6 = vld [vmem:[#allocation8 + $0xa0] ss:$8 sps:$4 sm:$0xff]   ;;  %v815_v8 = vld [vmem:[#allocation8 + $0x94] ss:$8 sps:$4 sm:$0xff]   ;;  %v819_v10 = vld [vmem:[#allocation8 + $0x90] ss:$8 sps:$4 sm:$0xff]  }
  0x39   :  { %516 = vmatpush1.bf16.xpose.msra.mxu0 %v747_v22  ;;  %559 = vmatpush1.bf16.xpose.msra.mxu1 %v748_v23  ;;  %v814_v7 = vld [vmem:[#allocation8 + $0x1a0] ss:$8 sps:$4 sm:$0xff]   ;;  %v817_v9 = vld [vmem:[#allocation8 + $0x194] ss:$8 sps:$4 sm:$0xff]   ;;  %v820_v11 = vld [vmem:[#allocation8 + $0x190] ss:$8 sps:$4 sm:$0xff]   ;;  %v87_v22 = vlaneseq }
  0x3a   :  { %517 = vmatprep.subr.bf16.mxu0 %v749_v24  ;;  %560 = vmatprep.subr.bf16.mxu1 %v751_v25  ;;  %v821_v12 = vld [vmem:[#allocation8 + $0x84] ss:$8 sps:$4 sm:$0xff]   ;;  %v825_v14 = vld [vmem:[#allocation8 + $0x80] ss:$8 sps:$4 sm:$0xff]   ;;  %s630_s2 = sshll.u32 %s922_s0, 4  ;;  %s631_s2 = int_to_ptr.vmem [resolvable:$true] %s630_s2 }
  0x3b   :  { %v823_v13 = vld [vmem:[#allocation8 + $0x184] ss:$8 sps:$4 sm:$0xff]   ;;  %v826_v15 = vld [vmem:[#allocation8 + $0x180] ss:$8 sps:$4 sm:$0xff]   ;;  %v88_v23 = vshrl.u32 %v87_v22, 7  ;;  %s891_s28 = scalar_lea.vmem %s631_s2, 512  ;;  %p896_p2 = scmp.lt.s32.totalorder %s631_s2, %s631_s2 }
  0x3c   :  { %p892_p1 = scmp.ne.s32.totalorder %s631_s2, %s891_s28  ;;  %p897_p3 = scmp.lt.s32.totalorder %s891_s28, %s891_s28 }
  0x3d   :  { %v89_v24 = vsub.s32 0, %v88_v23  ;;  %v93_v25 = vsub.s32 1, %v88_v23 }
  0x3e   :  { %p898_p4 = por %p897_p3, %p896_p2 }
  0x40   :  { %p899_p5 = pnand %p898_p4, %p892_p1 }
  0x41   :  { %518 = vmatpush1.bf16.xpose.msra.mxu0 %v753_v26  ;;  %561 = vmatpush1.bf16.xpose.msra.mxu1 %v754_v27  ;;  %v85_v27 = vld [vmem:[#allocation6] sm:$0x3] }
  0x42   :  { %519 = vmatprep.subr.bf16.mxu0 %v755_v28  ;;  %562 = vmatprep.subr.bf16.mxu1 %v757_v29  ;;  %v90_v29 = vrot.slane %v85_v27, %v89_v24 }
  0x49   :  { %520 = vmatpush1.bf16.xpose.msra.mxu0 %v759_v30  ;;  %563 = vmatpush1.bf16.xpose.msra.mxu1 %v760_v31  ;;  %v94_v30 = vrot.slane %v85_v27, %v93_v25 }
  0x4a   :  { %521 = vmatprep.subr.bf16.mxu0 %v761_v32  ;;  %564 = vmatprep.subr.bf16.mxu1 %v763_v33 }
  0x51   :  { %522 = vmatpush1.bf16.xpose.msra.mxu0 %v765_v34  ;;  %565 = vmatpush1.bf16.xpose.msra.mxu1 %v766_v35 }
  0x52   :  { %523 = vmatprep.subr.bf16.mxu0 %v767_v36  ;;  %566 = vmatprep.subr.bf16.mxu1 %v769_v37 }
  0x59   :  { %524 = vmatpush1.bf16.xpose.msra.mxu0 %v771_v38  ;;  %567 = vmatpush1.bf16.xpose.msra.mxu1 %v772_v39 }
  0x5a   :  { %525 = vmatprep.subr.bf16.mxu0 %v773_v40  ;;  %568 = vmatprep.subr.bf16.mxu1 %v775_v41 }
  0x61   :  { %526 = vmatpush1.bf16.xpose.msra.mxu0 %v777_v42  ;;  %569 = vmatpush1.bf16.xpose.msra.mxu1 %v778_v43 }
  0x62   :  { %527 = vmatprep.subr.bf16.mxu0 %v779_v44  ;;  %570 = vmatprep.subr.bf16.mxu1 %v781_v45 }
  0x69   :  { %528 = vmatpush2.bf16.xpose.msra.mxu0 %v783_v46  ;;  %571 = vmatpush2.bf16.xpose.msra.mxu1 %v784_v47 }
  0x6a   :  { %529 = vmatprep.subr.bf16.mxu0 %v785_v48  ;;  %572 = vmatprep.subr.bf16.mxu1 %v787_v49 }
  0x71   :  { %530 = vmatpush2.bf16.xpose.msra.mxu0 %v789_v50  ;;  %573 = vmatpush2.bf16.xpose.msra.mxu1 %v790_v51 }
  0x72   :  { %531 = vmatprep.subr.bf16.mxu0 %v791_v52  ;;  %574 = vmatprep.subr.bf16.mxu1 %v793_v53 }
  0x79   :  { %532 = vmatpush2.bf16.xpose.msra.mxu0 %v795_v54  ;;  %575 = vmatpush2.bf16.xpose.msra.mxu1 %v796_v55 }
  0x7a   :  { %533 = vmatprep.subr.bf16.mxu0 %v797_v56  ;;  %576 = vmatprep.subr.bf16.mxu1 %v799_v57 }
  0x81   :  { %534 = vmatpush2.bf16.xpose.msra.mxu0 %v801_v58  ;;  %577 = vmatpush2.bf16.xpose.msra.mxu1 %v802_v59 }
  0x82   :  { %535 = vmatprep.subr.bf16.mxu0 %v803_v60  ;;  %578 = vmatprep.subr.bf16.mxu1 %v805_v61 }
  0x89   :  { %536 = vmatpush2.bf16.xpose.msra.mxu0 %v807_v62  ;;  %579 = vmatpush2.bf16.xpose.msra.mxu1 %v808_v63 }
  0x8a   :  { %537 = vmatprep.subr.bf16.mxu0 %v809_v0  ;;  %580 = vmatprep.subr.bf16.mxu1 %v811_v1 }
  0x91   :  { %538 = vmatpush2.bf16.xpose.msra.mxu0 %v813_v6  ;;  %581 = vmatpush2.bf16.xpose.msra.mxu1 %v814_v7 }
  0x92   :  { %539 = vmatprep.subr.bf16.mxu0 %v815_v8  ;;  %582 = vmatprep.subr.bf16.mxu1 %v817_v9 }
  0x99   :  { %540 = vmatpush2.bf16.xpose.msra.mxu0 %v819_v10  ;;  %583 = vmatpush2.bf16.xpose.msra.mxu1 %v820_v11 }
  0x9a   :  { %541 = vmatprep.subr.bf16.mxu0 %v821_v12  ;;  %584 = vmatprep.subr.bf16.mxu1 %v823_v13 }
  0xa1   :  { %542 = vmatpush2.bf16.xpose.msra.mxu0 %v825_v14  ;;  %585 = vmatpush2.bf16.xpose.msra.mxu1 %v826_v15 }
  0xb5   :  { %v70_v16 = vpop.xlane.xlu0 %69 }
  0xb6   :  { %v75_v17 = vmul.f32 0.00390625, %v70_v16 }
  0xb8   :  { %v77_v18 = vadd.f32 1e-05, %v75_v17 }
  0xb9   :  { %v73_v19 = vpop.xlane.xlu0 %72 }
  0xba   :  { %827 = vrsqrt.f32 %v77_v18  ;;  %v76_v20 = vmul.f32 0.00390625, %v73_v19 }
  0xbc   :  { %v78_v21 = vadd.f32 1e-05, %v76_v20 }
  0xbe   :  { %829 = vrsqrt.f32 %v78_v21 }
  0xc7   :  { %v828_v26 = vpop.eup %827 }
  0xc8   :  { %v82_v28 = vmul.f32 %v828_v26, %v956_v3  ;;  %v81_v31 = vmul.f32 %v828_v26, %v954_v2 }
  0xca   :  { %v98_v35 = vmul.f32 %v94_v30, %v82_v28  ;;  %v97_v37 = vmul.f32 %v90_v29, %v81_v31 }
  0xcb   :  { %v830_v32 = vpop.eup %829 }
  0xcc   :  { %v84_v33 = vmul.f32 %v830_v32, %v960_v5  ;;  %v83_v34 = vmul.f32 %v830_v32, %v958_v4 }
  0xce   :  { %v100_v36 = vmul.f32 %v94_v30, %v84_v33  ;;  %v99_v38 = vmul.f32 %v90_v29, %v83_v34 }
  0xd0   :  { %v722_v39 = vpack.c.bf16 %v100_v36, %v98_v35  ;;  %v721_v40 = vpack.c.bf16 %v99_v38, %v97_v37 }
  0xd2   :  { %543 = vmatprep.mubr.bf16.mxu0 %v722_v39  ;;  %586 = vmatprep.mubr.bf16.mxu1 %v722_v39 }
  0xd3   :  { %544 = vmatmul.mubr.bf16.vlgmr.msra.gmra.mxu0 %v721_v40  ;;  %587 = vmatmul.mubr.bf16.vlgmr.msra.gmra.mxu1 %v721_v40 }
 0x193   :  { %v545_v3 = vpop.f32.mrf.mxu0  ;;  %v588_v41 = vpop.f32.mrf.mxu1 }
 0x195   :  { %v547_v42 = vpop.f32.mrf.mxu0  ;;  %v590_v43 = vpop.f32.mrf.mxu1 }
 0x196   :  { %v717_v2 = vpack.c.bf16 %v547_v42, %v545_v3  ;;  %v718_v44 = vpack.c.bf16 %v590_v43, %v588_v41 }
 0x197   :  { %v549_v5 = vpop.f32.mrf.mxu0  ;;  %v592_v4 = vpop.f32.mrf.mxu1 }
 0x198   :  { %621 = vst [vmem:[#allocation9] sm:$0xff] %v717_v2  ;;  %622 = vst [vmem:[#allocation9 + $0x8] sm:$0xff] %v718_v44 }
 0x199   :  { %v551_v45 = vpop.f32.mrf.mxu0  ;;  %v594_v46 = vpop.f32.mrf.mxu1 }
 0x19a   :  { %v719_v47 = vpack.c.bf16 %v551_v45, %v549_v5  ;;  %v720_v48 = vpack.c.bf16 %v594_v46, %v592_v4 }
 0x19c   :  { %623 = vst [vmem:[#allocation9 + $0x10] sm:$0xff] %v719_v47  ;;  %624 = vst [vmem:[#allocation9 + $0x18] sm:$0xff] %v720_v48 }
 0x19d   :  { %902 = shalt.err (!%p899_p5)
}
 0x19e   :  { %s923_s29 = smov 256   ;;  %s924_s30 = smov 16  }
 0x19f   :  { %636 = dma.vmem_to_hbm [thread:$0]  %s631_s2, 512, %s980_s3, [#allocation5], %s923_s29, %s923_s29, %s924_s30  }
 0x1a0   :  { %915 = dma.done.wait [#allocation5], 512  }
 0x1a1   :  { %916 = vsyncadd [#allocation5], 4294966784 }
 0x1a2   :  { %640 = vsyncpa [#allocation4], 1 }
 0x1a3   :  { %641 = vsyncpa [#allocation7], 1 }
 0x1a4   :  { %642 = vsyncpa [#allocation5], 1 }

</bundles_post_ra>
